<compile_context>
chip_gen: v7x
topology: tpu7x:2x2x1
jax: 0.10.0
libtpu: 0.0.40
codegen_flags: <defaults>
</compile_context>

<pallas_src>
import functools

import jax
import jax.numpy as jnp
from jax.experimental import pallas as pl
from jax.experimental.pallas import tpu as pltpu


def _preprocess_kernel(x_ref, o_ref, *, bt):
    # x_ref: (bt, hw_tile, C)  input dtype (typically uint8)
    # o_ref: (bt, C, hw_tile)  float32
    for i in range(bt):                        # static; bt is tiny
        x = x_ref[i].astype(jnp.float32)       # .float()            (VPU)
        o_ref[i] = x.T / 255.0                 # HWC->CHW (XLU) + scale (VPU)


def _pick_hw_tile(hw):
    """Spatial tile along the flattened H*W axis; bounds per-step VMEM."""
    if hw <= 8192:
        return hw
    for t in (8192, 4096, 2048, 1024):         # multiples of 8 and 128
        if hw % t == 0:
            return t
    return hw                                   # fall back: whole plane


def preprocess(x, *, batch_tile=None):
    """Pallas TPU equivalent of PreProcess.forward.

    x: (H, W), (H, W, C) or (B, H, W, C) image, any dtype (typically uint8).
    Returns float32 (1, H, W), (C, H, W) or (B, C, H, W) scaled by 1/255.
    """
    if x.ndim == 2:                             # grayscale -> (H, W, 1)
        x = x[:, :, None]
    squeeze_batch = x.ndim == 3
    if squeeze_batch:
        x = x[None]
    B, H, W, C = x.shape
    hw = H * W
    hw_tile = _pick_hw_tile(hw)
    n_hw = hw // hw_tile

    if batch_tile is None:
        # Group tiny samples per grid step (amortizes ~0.35us/step overhead),
        # but keep >= 2 grid steps so v7x's two TensorCores both get work.
        batch_tile = 1
        step_bytes = hw_tile * C * (x.dtype.itemsize + 4)
        while (n_hw == 1 and B % (2 * batch_tile) == 0
               and B // (2 * batch_tile) >= 2
               and step_bytes * 2 * batch_tile <= (1 << 20)):
            batch_tile *= 2
    assert B % batch_tile == 0

    # Free view of the same HBM bytes: (B, H, W, C) -> (B, H*W, C).
    # (For very large images a (B, H, W*C) view would also make the inbound
    #  DMA lane-dense; kept simple here since the transform is memory-trivial.)
    x2 = x.reshape(B, hw, C)

    out2 = pl.pallas_call(
        functools.partial(_preprocess_kernel, bt=batch_tile),
        out_shape=jax.ShapeDtypeStruct((B, C, hw), jnp.float32),
        grid=(B // batch_tile, n_hw),
        in_specs=[pl.BlockSpec((batch_tile, hw_tile, C),
                               lambda bi, ti: (bi, ti, 0))],
        out_specs=pl.BlockSpec((batch_tile, C, hw_tile),
                               lambda bi, ti: (bi, 0, ti)),
        compiler_params=pltpu.CompilerParams(
            dimension_semantics=("parallel", "parallel")),
    )(x2)

    out = out2.reshape(B, C, H, W)
    return out[0] if squeeze_batch else out


if __name__ == "__main__":
    key = jax.random.PRNGKey(0)
    k1, k2 = jax.random.split(key)

    H, W, C = 16, 16, 3
    B = 2
    # Canonical PreProcess input: uint8 HWC image(s) with values in [0, 255].
    img = jax.random.randint(k1, (H, W, C), 0, 256, dtype=jnp.int32).astype(jnp.uint8)
    batch = jax.random.randint(k2, (B, H, W, C), 0, 256, dtype=jnp.int32).astype(jnp.uint8)

    out1 = preprocess(img)          # (C, H, W)  -- keepdim=True path
    out2 = preprocess(batch)        # (B, C, H, W)
    jax.block_until_ready((out1, out2))

    ref1 = jnp.transpose(img, (2, 0, 1)).astype(jnp.float32) / 255.0
    ref2 = jnp.transpose(batch, (0, 3, 1, 2)).astype(jnp.float32) / 255.0

    assert out1.shape == (C, H, W), out1.shape
    assert out2.shape == (B, C, H, W), out2.shape
    assert out1.dtype == jnp.float32 and out2.dtype == jnp.float32
    assert bool(jnp.all(jnp.isfinite(out1))) and bool(jnp.all(jnp.isfinite(out2)))
    assert bool(jnp.all((out1 >= 0.0) & (out1 <= 1.0)))
    assert bool(jnp.all((out2 >= 0.0) & (out2 <= 1.0)))
    assert bool(jnp.allclose(out1, ref1, atol=1e-6))
    assert bool(jnp.allclose(out2, ref2, atol=1e-6))
    print("KERNEL_OK")
</pallas_src>

<mosaic_0001>
module attributes {stable_mosaic.version = 11 : i64} {
  func.func @_preprocess_kernel(%arg0: i32, %arg1: i32, %arg2: memref<1x256x3xi8, #tpu.memory_space<vmem>>, %arg3: memref<1x3x256xf32, #tpu.memory_space<vmem>>) attributes {dimension_semantics = [#tpu.dimension_semantics<parallel>, #tpu.dimension_semantics<parallel>], iteration_bounds = array<i64: 1, 1>, scalar_prefetch = 0 : i64, scratch_operands = 0 : i64, tpu.core_type = #tpu.core_type<tc>, window_params = [{transform_indices = @transform_0, window_bounds = array<i64: 1, 256, 3>}, {transform_indices = @transform_1, window_bounds = array<i64: 1, 3, 256>}]} {
    %c0 = arith.constant 0 : index
    %c0_0 = arith.constant 0 : index
    %c0_1 = arith.constant 0 : index
    %0 = vector.load %arg2[%c0, %c0_0, %c0_1] : memref<1x256x3xi8, #tpu.memory_space<vmem>>, vector<1x256x3xi8>
    %1 = vector.shape_cast %0 : vector<1x256x3xi8> to vector<256x3xi8>
    %2 = arith.uitofp %1 : vector<256x3xi8> to vector<256x3xf32>
    %3 = tpu.transpose %2, [1, 0] : vector<256x3xf32> -> vector<3x256xf32>
    %cst = arith.constant 2.550000e+02 : f32
    %4 = vector.broadcast %cst : f32 to vector<3x256xf32>
    %5 = arith.divf %3, %4 : vector<3x256xf32>
    %c0_2 = arith.constant 0 : index
    %c0_3 = arith.constant 0 : index
    %c0_4 = arith.constant 0 : index
    %6 = vector.load %arg3[%c0_2, %c0_3, %c0_4] : memref<1x3x256xf32, #tpu.memory_space<vmem>>, vector<1x3x256xf32>
    %7 = vector.shape_cast %6 : vector<1x3x256xf32> to vector<3x256xf32>
    %8 = vector.shape_cast %5 : vector<3x256xf32> to vector<1x3x256xf32>
    tpu.vector_store %arg3[%c0_2, %c0_3, %c0_4], %8 {strides = array<i32>} : memref<1x3x256xf32, #tpu.memory_space<vmem>>, vector<1x3x256xf32>,
    return
  }
  func.func @transform_0(%arg0: i32, %arg1: i32) -> (i32, i32, i32) {
    %c0_i32 = arith.constant 0 : i32
    %c0_i32_0 = arith.constant 0 : i32
    return %arg0, %arg1, %c0_i32 : i32, i32, i32
  }
  func.func @transform_1(%arg0: i32, %arg1: i32) -> (i32, i32, i32) {
    %c0_i32 = arith.constant 0 : i32
    %c0_i32_0 = arith.constant 0 : i32
    return %arg0, %c0_i32, %arg1 : i32, i32, i32
  }
}

</mosaic_0001>

<bundles_post_ra>
// kernel: tpu_custom_call.1
= control target key start
LH: loop header
LB: loop body
LE: loop exit
PB: predicated region body
PF: predicated region fallthrough
CT: control target
= control target key end

     0   :  { %s328_s0 = inlined_call_operand.vmem [shape: u8[1,256,3], index: 0, kind: input, shape index: {}]   ;;  %s329_s1 = inlined_call_operand.vmem [shape: f32[1,3,256], index: 1, kind: output, shape index: {}]  }
   0x1   :  { %v283_v0 = vld [vmem:[%s328_s0 + $0x20] sm:$0xff]   ;;  %v285_v20 = vld [vmem:[%s328_s0 + $0x28] sm:$0xff]   ;;  %v287_v46 = vld [vmem:[%s328_s0 + $0x30] sm:$0xff]  }
   0x2   :  { %v213_v1 = vld [vmem:[%s328_s0] sm:$0xff]   ;;  %v246_v2 = vunpack.c.0.s8 %v283_v0  ;;  %v247_v4 = vunpack.c.1.s8 %v283_v0  ;;  %v250_v6 = vunpack.c.2.s8 %v283_v0  ;;  %v251_v14 = vunpack.c.3.s8 %v283_v0  ;;  %v277_v21 = vld [vmem:[%s328_s0 + $0x8] sm:$0xff]   ;;  %v279_v47 = vld [vmem:[%s328_s0 + $0x10] sm:$0xff]  }
   0x3   :  { %v214_v3 = vunpack.c.0.s8 %v213_v1  ;;  %v215_v5 = vunpack.c.1.s8 %v213_v1  ;;  %v218_v7 = vunpack.c.2.s8 %v213_v1  ;;  %v219_v15 = vunpack.c.3.s8 %v213_v1 }
   0x4   :  { %v88_v8 = vand.u32 255, %v246_v2  ;;  %v89_v10 = vand.u32 255, %v247_v4  ;;  %v90_v18 = vand.u32 255, %v250_v6  ;;  %v91_v22 = vand.u32 255, %v251_v14 }
   0x5   :  { %v72_v9 = vand.u32 255, %v214_v3  ;;  %v73_v11 = vand.u32 255, %v215_v5  ;;  %v74_v19 = vand.u32 255, %v218_v7  ;;  %v75_v23 = vand.u32 255, %v219_v15 }
   0x6   :  { %v120_v12 = vcvt.s32.f32 %v88_v8  ;;  %v121_v16 = vcvt.s32.f32 %v89_v10  ;;  %v122_v24 = vcvt.s32.f32 %v90_v18  ;;  %v254_v26 = vunpack.c.0.s8 %v285_v20  ;;  %v289_v8 = vld [vmem:[%s328_s0 + $0x38] sm:$0xff]  }
   0x7   :  { %v104_v13 = vcvt.s32.f32 %v72_v9  ;;  %v105_v17 = vcvt.s32.f32 %v73_v11  ;;  %v106_v25 = vcvt.s32.f32 %v74_v19  ;;  %v222_v27 = vunpack.c.0.s8 %v277_v21  ;;  %v281_v9 = vld [vmem:[%s328_s0 + $0x18] sm:$0xff]  }
   0x8   :  { %168 = vxpose.xlu1.b32.start [1/16] (narrow) %v120_v12, 8  ;;  %v123_v28 = vcvt.s32.f32 %v91_v22  ;;  %v107_v29 = vcvt.s32.f32 %v75_v23  ;;  %v92_v30 = vand.u32 255, %v254_v26  ;;  %v255_v32 = vunpack.c.1.s8 %v285_v20 }
   0x9   :  { %136 = vxpose.xlu0.b32.start [1/16] (narrow) %v104_v13, 8  ;;  %v76_v31 = vand.u32 255, %v222_v27  ;;  %v223_v33 = vunpack.c.1.s8 %v277_v21  ;;  %v258_v34 = vunpack.c.2.s8 %v285_v20  ;;  %v226_v35 = vunpack.c.2.s8 %v277_v21 }
   0xa   :  { %v124_v36 = vcvt.s32.f32 %v92_v30  ;;  %v93_v38 = vand.u32 255, %v255_v32  ;;  %v259_v40 = vunpack.c.3.s8 %v285_v20  ;;  %v227_v41 = vunpack.c.3.s8 %v277_v21 }
   0xb   :  { %v108_v37 = vcvt.s32.f32 %v76_v31  ;;  %v77_v39 = vand.u32 255, %v223_v33  ;;  %v94_v44 = vand.u32 255, %v258_v34  ;;  %v78_v45 = vand.u32 255, %v226_v35 }
   0xc   :  { %169 = vxpose.xlu1.b32.cont [2/16] (narrow) %v121_v16, 8  ;;  %v125_v42 = vcvt.s32.f32 %v93_v38  ;;  %v95_v48 = vand.u32 255, %v259_v40  ;;  %v79_v49 = vand.u32 255, %v227_v41  ;;  %v262_v52 = vunpack.c.0.s8 %v287_v46 }
   0xd   :  { %137 = vxpose.xlu0.b32.cont [2/16] (narrow) %v105_v17, 8  ;;  %v109_v43 = vcvt.s32.f32 %v77_v39  ;;  %v126_v50 = vcvt.s32.f32 %v94_v44  ;;  %v110_v51 = vcvt.s32.f32 %v78_v45  ;;  %v230_v53 = vunpack.c.0.s8 %v279_v47 }
   0xe   :  { %v127_v54 = vcvt.s32.f32 %v95_v48  ;;  %v111_v55 = vcvt.s32.f32 %v79_v49  ;;  %v96_v56 = vand.u32 255, %v262_v52  ;;  %v263_v58 = vunpack.c.1.s8 %v287_v46 }
   0xf   :  { %v80_v57 = vand.u32 255, %v230_v53  ;;  %v231_v59 = vunpack.c.1.s8 %v279_v47  ;;  %v266_v60 = vunpack.c.2.s8 %v287_v46  ;;  %v234_v61 = vunpack.c.2.s8 %v279_v47 }
  0x10   :  { %170 = vxpose.xlu1.b32.cont [3/16] (narrow) %v122_v24, 8  ;;  %v128_v62 = vcvt.s32.f32 %v96_v56  ;;  %v97_v0 = vand.u32 255, %v263_v58  ;;  %v267_v2 = vunpack.c.3.s8 %v287_v46  ;;  %v235_v3 = vunpack.c.3.s8 %v279_v47 }
  0x11   :  { %138 = vxpose.xlu0.b32.cont [3/16] (narrow) %v106_v25, 8  ;;  %v112_v63 = vcvt.s32.f32 %v80_v57  ;;  %v81_v1 = vand.u32 255, %v231_v59  ;;  %v98_v6 = vand.u32 255, %v266_v60  ;;  %v82_v7 = vand.u32 255, %v234_v61 }
  0x12   :  { %v129_v4 = vcvt.s32.f32 %v97_v0  ;;  %v99_v10 = vand.u32 255, %v267_v2  ;;  %v83_v11 = vand.u32 255, %v235_v3  ;;  %v270_v14 = vunpack.c.0.s8 %v289_v8 }
  0x13   :  { %v113_v5 = vcvt.s32.f32 %v81_v1  ;;  %v130_v12 = vcvt.s32.f32 %v98_v6  ;;  %v114_v13 = vcvt.s32.f32 %v82_v7  ;;  %v238_v15 = vunpack.c.0.s8 %v281_v9 }
  0x14   :  { %171 = vxpose.xlu1.b32.cont [4/16] (narrow) %v123_v28, 8  ;;  %v131_v16 = vcvt.s32.f32 %v99_v10  ;;  %v115_v17 = vcvt.s32.f32 %v83_v11  ;;  %v100_v18 = vand.u32 255, %v270_v14  ;;  %v271_v20 = vunpack.c.1.s8 %v289_v8 }
  0x15   :  { %139 = vxpose.xlu0.b32.cont [4/16] (narrow) %v107_v29, 8  ;;  %v84_v19 = vand.u32 255, %v238_v15  ;;  %v239_v21 = vunpack.c.1.s8 %v281_v9  ;;  %v274_v22 = vunpack.c.2.s8 %v289_v8  ;;  %v242_v23 = vunpack.c.2.s8 %v281_v9 }
  0x16   :  { %v132_v24 = vcvt.s32.f32 %v100_v18  ;;  %v101_v26 = vand.u32 255, %v271_v20  ;;  %v275_v28 = vunpack.c.3.s8 %v289_v8  ;;  %v243_v29 = vunpack.c.3.s8 %v281_v9 }
  0x17   :  { %v116_v25 = vcvt.s32.f32 %v84_v19  ;;  %v85_v27 = vand.u32 255, %v239_v21  ;;  %v102_v32 = vand.u32 255, %v274_v22  ;;  %v86_v33 = vand.u32 255, %v242_v23 }
  0x18   :  { %172 = vxpose.xlu1.b32.cont [5/16] (narrow) %v124_v36, 8  ;;  %v133_v30 = vcvt.s32.f32 %v101_v26  ;;  %v103_v36 = vand.u32 255, %v275_v28 }
  0x19   :  { %140 = vxpose.xlu0.b32.cont [5/16] (narrow) %v108_v37, 8  ;;  %v117_v31 = vcvt.s32.f32 %v85_v27  ;;  %v134_v34 = vcvt.s32.f32 %v102_v32  ;;  %v118_v35 = vcvt.s32.f32 %v86_v33  ;;  %v87_v37 = vand.u32 255, %v243_v29 }
  0x1a   :  { %v135_v38 = vcvt.s32.f32 %v103_v36 }
  0x1b   :  { %v119_v39 = vcvt.s32.f32 %v87_v37 }
  0x1c   :  { %173 = vxpose.xlu1.b32.cont [6/16] (narrow) %v125_v42, 8 }
  0x1d   :  { %141 = vxpose.xlu0.b32.cont [6/16] (narrow) %v109_v43, 8 }
  0x20   :  { %174 = vxpose.xlu1.b32.cont [7/16] (narrow) %v126_v50, 8 }
  0x21   :  { %142 = vxpose.xlu0.b32.cont [7/16] (narrow) %v110_v51, 8 }
  0x24   :  { %175 = vxpose.xlu1.b32.cont [8/16] (narrow) %v127_v54, 8 }
  0x25   :  { %143 = vxpose.xlu0.b32.cont [8/16] (narrow) %v111_v55, 8 }
  0x28   :  { %176 = vxpose.xlu1.b32.cont [9/16] (narrow) %v128_v62, 8 }
  0x29   :  { %144 = vxpose.xlu0.b32.cont [9/16] (narrow) %v112_v63, 8 }
  0x2c   :  { %177 = vxpose.xlu1.b32.cont [10/16] (narrow) %v129_v4, 8 }
  0x2d   :  { %145 = vxpose.xlu0.b32.cont [10/16] (narrow) %v113_v5, 8 }
  0x30   :  { %178 = vxpose.xlu1.b32.cont [11/16] (narrow) %v130_v12, 8 }
  0x31   :  { %146 = vxpose.xlu0.b32.cont [11/16] (narrow) %v114_v13, 8 }
  0x34   :  { %179 = vxpose.xlu1.b32.cont [12/16] (narrow) %v131_v16, 8 }
  0x35   :  { %147 = vxpose.xlu0.b32.cont [12/16] (narrow) %v115_v17, 8 }
  0x38   :  { %180 = vxpose.xlu1.b32.cont [13/16] (narrow) %v132_v24, 8 }
  0x39   :  { %148 = vxpose.xlu0.b32.cont [13/16] (narrow) %v116_v25, 8 }
  0x3c   :  { %181 = vxpose.xlu1.b32.cont [14/16] (narrow) %v133_v30, 8 }
  0x3d   :  { %149 = vxpose.xlu0.b32.cont [14/16] (narrow) %v117_v31, 8 }
  0x40   :  { %182 = vxpose.xlu1.b32.cont [15/16] (narrow) %v134_v34, 8 }
  0x41   :  { %150 = vxpose.xlu0.b32.cont [15/16] (narrow) %v118_v35, 8 }
  0x44   :  { %183 = vxpose.xlu1.b32.end [16/16] (narrow) %v135_v38, 8 }
  0x45   :  { %151 = vxpose.xlu0.b32.end [16/16] (narrow) %v119_v39, 8 }
  0x88   :  { %v184_v40 = vpop.trf.xlu1 }
  0x89   :  { %v152_v41 = vpop.trf.xlu0  ;;  %v202_v42 = vmul.f32 0.003921569, %v184_v40 }
  0x8a   :  { %v201_v43 = vmul.f32 0.003921569, %v152_v41 }
  0x8c   :  { %v205_v44 = vcombine.low %v201_v43, %v202_v42 }
  0x8e   :  { %207 = vst [vmem:[%s329_s1] sm:$0x77] %v205_v44 }

</bundles_post_ra>
